<compile_context>
chip_gen: v7x
topology: tpu7x:2x2x1
jax: 0.10.0
libtpu: 0.0.40
codegen_flags: <defaults>
</compile_context>

<pallas_src>
import functools

import jax
import jax.numpy as jnp
from jax.experimental import pallas as pl
from jax.experimental.pallas import tpu as pltpu

_EPS = 1e-5


# ----------------------------------------------------------------------------- kernels
def _slab_kernel(x_ref, p_ref, o_ref):
    # x_ref: (TN, C, HW); p_ref: (TN, C, 3) = [gamma, gamma*alpha, beta]; o_ref like x_ref.
    x = x_ref[...].astype(jnp.float32)
    c = x.shape[1]
    inv_hw = 1.0 / x.shape[-1]

    # Single fused reduction pass: per-channel spatial sum and sum-of-squares.
    s1 = jnp.sum(x, axis=-1, keepdims=True)                  # (TN, C, 1)
    s2 = jnp.sum(x * x, axis=-1, keepdims=True)              # (TN, C, 1)
    mu = s1 * inv_hw
    # biased variance (InstanceNorm2d); clamp guards the E[x^2]-E[x]^2 form.
    var = jnp.maximum(s2 * inv_hw - mu * mu, 0.0)
    inv_std = jax.lax.rsqrt(var + _EPS)

    # Cross-channel standardization of the per-channel means (sublane reduction,
    # stays in (., C, 1) layout -- no lane<->sublane relayout).
    # torch.var default is unbiased (ddof = 1).
    m = jnp.mean(mu, axis=1, keepdims=True)                  # (TN, 1, 1)
    v = jnp.sum((mu - m) ** 2, axis=1, keepdims=True) / jnp.float32(c - 1)
    means_n = (mu - m) * jax.lax.rsqrt(v + _EPS)             # (TN, C, 1)

    p = p_ref[...].astype(jnp.float32)                       # (TN, C, 3)
    gamma, galpha, beta = p[..., 0:1], p[..., 1:2], p[..., 2:3]
    scale = gamma * inv_std                                  # (TN, C, 1)
    shift = galpha * means_n + beta - scale * mu             # (TN, C, 1)

    # out = gamma*((x-mu)*inv_std + alpha*means_n) + beta  ==  scale*x + shift
    o_ref[...] = (x * scale + shift).astype(o_ref.dtype)


def _stats_kernel(x_ref, p_ref, ss_ref, s1_ref, s2_ref, *, hw_total):
    # Pass 1 of the HW-tiled path: accumulate per-channel sum / sumsq over HW tiles,
    # emit fused (scale, shift) on the last tile.
    t = pl.program_id(1)

    @pl.when(t == 0)
    def _init():
        s1_ref[...] = jnp.zeros_like(s1_ref)
        s2_ref[...] = jnp.zeros_like(s2_ref)

    x = x_ref[...].astype(jnp.float32)                       # (1, C, T)
    s1_ref[...] += jnp.sum(x, axis=-1, keepdims=True)
    s2_ref[...] += jnp.sum(x * x, axis=-1, keepdims=True)

    @pl.when(t == pl.num_programs(1) - 1)
    def _finalize():
        c = s1_ref.shape[1]
        inv_hw = 1.0 / hw_total
        mu = s1_ref[...] * inv_hw
        var = jnp.maximum(s2_ref[...] * inv_hw - mu * mu, 0.0)
        inv_std = jax.lax.rsqrt(var + _EPS)
        m = jnp.mean(mu, axis=1, keepdims=True)
        v = jnp.sum((mu - m) ** 2, axis=1, keepdims=True) / jnp.float32(c - 1)
        means_n = (mu - m) * jax.lax.rsqrt(v + _EPS)
        p = p_ref[...].astype(jnp.float32)
        gamma, galpha, beta = p[..., 0:1], p[..., 1:2], p[..., 2:3]
        scale = gamma * inv_std
        shift = galpha * means_n + beta - scale * mu
        ss_ref[...] = jnp.concatenate([scale, shift], axis=-1)   # (1, C, 2)


def _apply_kernel(x_ref, ss_ref, o_ref):
    # Pass 2 of the HW-tiled path: out = scale * x + shift.
    x = x_ref[...].astype(jnp.float32)
    ss = ss_ref[...]
    o_ref[...] = (x * ss[..., 0:1] + ss[..., 1:2]).astype(o_ref.dtype)


# ----------------------------------------------------------------------------- helpers
def _choose_tn(n, c, hw, budget_bytes):
    """Batch fold: keep x block under budget, divide N, leave >=2 grid steps when N>1
    so both v7x TensorCores get work (also fills sublanes in the small-C regime)."""
    max_fit = max(1, budget_bytes // (c * hw * 4))
    cap = n if n == 1 else max(1, n // 2)
    tn = max(1, min(n, max_fit, cap))
    while n % tn:
        tn -= 1
    return tn


def _choose_hw_tile(hw, c, budget_bytes):
    """Largest multiple of 128 that divides HW with C*T*4 <= budget (None if impossible)."""
    if hw % 128:
        return None
    max_t = max(128, (budget_bytes // (c * 4)) // 128 * 128)
    t = min(hw, max_t)
    t -= t % 128
    while t >= 128 and hw % t:
        t -= 128
    return t if t >= 128 and hw % t == 0 else None


def _vmem_limit(block_bytes):
    # block + double-buffered in/out + elementwise intermediates, capped well under
    # v7x's 64 MiB physical VMEM; floor of 16 MiB is safe on every TPU generation.
    return int(min(48 * 2**20, max(16 * 2**20, 8 * block_bytes + 2 * 2**20)))


# ----------------------------------------------------------------------------- wrappers
def instance_norm_2d_plus_core(x, params, *, slab_budget_bytes=4 * 2**20):
    """x: (N, C, H, W); params: (N, C, 3) = [gamma, gamma*alpha, beta] (f32)."""
    N, C, H, W = x.shape
    HW = H * W
    x2 = x.reshape(N, C, HW)
    out_dtype = x.dtype
    slab_bytes = C * HW * 4

    hw_tile = _choose_hw_tile(HW, C, slab_budget_bytes)

    if slab_bytes <= slab_budget_bytes or hw_tile is None:
        # ---------------- single-slab path ----------------
        tn = _choose_tn(N, C, HW, slab_budget_bytes)
        out = pl.pallas_call(
            _slab_kernel,
            out_shape=jax.ShapeDtypeStruct((N, C, HW), out_dtype),
            grid_spec=pltpu.PrefetchScalarGridSpec(
                num_scalar_prefetch=0,
                grid=(N // tn,),
                in_specs=[
                    pl.BlockSpec((tn, C, HW), lambda n: (n, 0, 0)),
                    pl.BlockSpec((tn, C, 3), lambda n: (n, 0, 0)),
                ],
                out_specs=pl.BlockSpec((tn, C, HW), lambda n: (n, 0, 0)),
            ),
            compiler_params=pltpu.CompilerParams(
                dimension_semantics=("parallel",),
                vmem_limit_bytes=_vmem_limit(tn * slab_bytes),
            ),
        )(x2, params)
        return out.reshape(N, C, H, W)

    # ---------------- HW-tiled two-pass path (large feature maps) ----------------
    T = hw_tile
    nt = HW // T
    block_bytes = C * T * 4
    limit = _vmem_limit(block_bytes)

    scale_shift = pl.pallas_call(
        functools.partial(_stats_kernel, hw_total=HW),
        out_shape=jax.ShapeDtypeStruct((N, C, 2), jnp.float32),
        grid_spec=pltpu.PrefetchScalarGridSpec(
            num_scalar_prefetch=0,
            grid=(N, nt),
            in_specs=[
                pl.BlockSpec((1, C, T), lambda n, t: (n, 0, t)),
                pl.BlockSpec((1, C, 3), lambda n, t: (n, 0, 0)),
            ],
            out_specs=pl.BlockSpec((1, C, 2), lambda n, t: (n, 0, 0)),
            scratch_shapes=[
                pltpu.VMEM((1, C, 1), jnp.float32),
                pltpu.VMEM((1, C, 1), jnp.float32),
            ],
        ),
        compiler_params=pltpu.CompilerParams(
            dimension_semantics=("parallel", "arbitrary"),
            vmem_limit_bytes=limit,
        ),
    )(x2, params)

    out = pl.pallas_call(
        _apply_kernel,
        out_shape=jax.ShapeDtypeStruct((N, C, HW), out_dtype),
        grid_spec=pltpu.PrefetchScalarGridSpec(
            num_scalar_prefetch=0,
            grid=(N, nt),
            in_specs=[
                pl.BlockSpec((1, C, T), lambda n, t: (n, 0, t)),
                pl.BlockSpec((1, C, 2), lambda n, t: (n, 0, 0)),
            ],
            out_specs=pl.BlockSpec((1, C, T), lambda n, t: (n, 0, t)),
        ),
        compiler_params=pltpu.CompilerParams(
            dimension_semantics=("parallel", "parallel"),
            vmem_limit_bytes=limit,
        ),
    )(x2, scale_shift)
    return out.reshape(N, C, H, W)


def _fused_params(gamma, alpha, beta):
    """Pre-fuse affine params: [gamma, gamma*alpha, beta], packed (N, C, 3)."""
    return jnp.stack(
        [gamma, gamma * alpha, beta], axis=-1
    ).astype(jnp.float32)


def instance_norm_2d_plus(x, gamma, alpha, beta=None, *, slab_budget_bytes=4 * 2**20):
    """InstanceNorm2dPlus (the norm used inside NCSNv2): per-feature gamma/alpha/beta of shape (C,)."""
    N, C = x.shape[0], x.shape[1]
    if beta is None:
        beta = jnp.zeros_like(gamma)
    params = _fused_params(gamma, alpha, beta)                    # (C, 3)
    params = jnp.broadcast_to(params[None], (N, C, 3))
    return instance_norm_2d_plus_core(x, params, slab_budget_bytes=slab_budget_bytes)


def conditional_instance_norm_2d_plus(x, y, embed_w, *, bias=True,
                                      slab_budget_bytes=4 * 2**20):
    """Class-conditional variant: embed_w[y] -> per-sample (gamma, alpha[, beta])."""
    N, C = x.shape[0], x.shape[1]
    emb = embed_w[y]                                              # (N, 3C) plain-JAX gather
    if bias:
        gamma, alpha, beta = jnp.split(emb, 3, axis=-1)
    else:
        gamma, alpha = jnp.split(emb, 2, axis=-1)
        beta = jnp.zeros_like(gamma)
    params = _fused_params(gamma, alpha, beta)                    # (N, C, 3)
    return instance_norm_2d_plus_core(x, params, slab_budget_bytes=slab_budget_bytes)


# ----------------------------------------------------------------------------- reference
def _reference(x, gamma, alpha, beta):
    # Pure-JAX mirror of the PyTorch InstanceNorm2dPlus forward.
    N, C, H, W = x.shape
    gamma = jnp.broadcast_to(jnp.asarray(gamma), (N, C))
    alpha = jnp.broadcast_to(jnp.asarray(alpha), (N, C))
    beta = jnp.broadcast_to(jnp.asarray(beta), (N, C))
    means = jnp.mean(x, axis=(2, 3))
    m = jnp.mean(means, axis=-1, keepdims=True)
    v = jnp.var(means, axis=-1, keepdims=True, ddof=1)            # torch.var: unbiased
    means = (means - m) / jnp.sqrt(v + _EPS)
    mu = jnp.mean(x, axis=(2, 3), keepdims=True)
    var = jnp.var(x, axis=(2, 3), keepdims=True)                  # biased (InstanceNorm2d)
    h = (x - mu) / jnp.sqrt(var + _EPS)
    h = h + means[..., None, None] * alpha[..., None, None]
    return gamma[..., None, None] * h + beta[..., None, None]


# ----------------------------------------------------------------------------- test
if __name__ == "__main__":
    num_classes = 25
    key = jax.random.PRNGKey(0)
    k1, k2, k3, k4, k5, k6 = jax.random.split(key, 6)

    # --- case 1: conditional variant, small shapes (exercises the single-slab path) ---
    N, C, H, W = 2, 4, 16, 16
    x = jax.random.normal(k1, (N, C, H, W), dtype=jnp.float32)
    y = jax.random.randint(k2, (N,), 0, num_classes, dtype=jnp.int32)
    # Embedding init mirrors the PyTorch module: first 2C cols ~ N(1, 0.02), last C cols = 0.
    embed_w = jnp.concatenate(
        [1.0 + 0.02 * jax.random.normal(k3, (num_classes, 2 * C), dtype=jnp.float32),
         jnp.zeros((num_classes, C), dtype=jnp.float32)],
        axis=-1,
    )
    out1 = jax.block_until_ready(conditional_instance_norm_2d_plus(x, y, embed_w, bias=True))
    g1, a1, b1 = jnp.split(embed_w[y], 3, axis=-1)
    ref1 = _reference(x, g1, a1, b1)
    assert out1.shape == (N, C, H, W)
    assert jnp.allclose(out1, ref1, atol=1e-4, rtol=1e-4)

    # --- case 2: per-feature InstanceNorm2dPlus (as used in NCSNv2), tiny VMEM budget
    #     to force and validate the HW-tiled two-pass path on small shapes ---
    N2, C2, H2, W2 = 2, 8, 32, 32
    x2 = jax.random.normal(k4, (N2, C2, H2, W2), dtype=jnp.float32)
    gamma2 = 1.0 + 0.02 * jax.random.normal(k5, (C2,), dtype=jnp.float32)
    alpha2 = 1.0 + 0.02 * jax.random.normal(k6, (C2,), dtype=jnp.float32)
    beta2 = jnp.zeros((C2,), dtype=jnp.float32)
    out2 = jax.block_until_ready(
        instance_norm_2d_plus(x2, gamma2, alpha2, beta2, slab_budget_bytes=8 * 1024)
    )
    ref2 = _reference(x2, gamma2, alpha2, beta2)
    assert out2.shape == (N2, C2, H2, W2)
    assert jnp.allclose(out2, ref2, atol=1e-4, rtol=1e-4)

    print("KERNEL_OK")
</pallas_src>

<mosaic_0001>
module attributes {stable_mosaic.version = 11 : i64} {
  func.func @_slab_kernel(%arg0: i32, %arg1: memref<1x4x256xf32, #tpu.memory_space<vmem>>, %arg2: memref<1x4x3xf32, #tpu.memory_space<vmem>>, %arg3: memref<1x4x256xf32, #tpu.memory_space<vmem>>) attributes {dimension_semantics = [#tpu.dimension_semantics<parallel>], iteration_bounds = array<i64: 2>, scalar_prefetch = 0 : i64, scratch_operands = 0 : i64, tpu.core_type = #tpu.core_type<tc>, window_params = [{transform_indices = @transform_0, window_bounds = array<i64: 1, 4, 256>}, {transform_indices = @transform_1, window_bounds = array<i64: 1, 4, 3>}, {transform_indices = @transform_2, window_bounds = array<i64: 1, 4, 256>}]} {
    %c0 = arith.constant 0 : index
    %c0_0 = arith.constant 0 : index
    %c0_1 = arith.constant 0 : index
    %0 = vector.load %arg1[%c0, %c0_0, %c0_1] : memref<1x4x256xf32, #tpu.memory_space<vmem>>, vector<1x4x256xf32>
    %cst = arith.constant dense<0.000000e+00> : vector<1x4xf32>
    %1 = vector.multi_reduction <add>, %0, %cst [2] : vector<1x4x256xf32> to vector<1x4xf32>
    %2 = vector.shape_cast %1 : vector<1x4xf32> to vector<1x4x1xf32>
    %3 = arith.mulf %0, %0 : vector<1x4x256xf32>
    %cst_2 = arith.constant dense<0.000000e+00> : vector<1x4xf32>
    %4 = vector.multi_reduction <add>, %3, %cst_2 [2] : vector<1x4x256xf32> to vector<1x4xf32>
    %5 = vector.shape_cast %4 : vector<1x4xf32> to vector<1x4x1xf32>
    %cst_3 = arith.constant 3.906250e-03 : f32
    %6 = vector.broadcast %cst_3 : f32 to vector<1x4x1xf32>
    %7 = arith.mulf %2, %6 : vector<1x4x1xf32>
    %cst_4 = arith.constant 3.906250e-03 : f32
    %8 = vector.broadcast %cst_4 : f32 to vector<1x4x1xf32>
    %9 = arith.mulf %5, %8 : vector<1x4x1xf32>
    %10 = arith.mulf %7, %7 : vector<1x4x1xf32>
    %11 = arith.subf %9, %10 : vector<1x4x1xf32>
    %cst_5 = arith.constant 0.000000e+00 : f32
    %12 = vector.broadcast %cst_5 : f32 to vector<1x4x1xf32>
    %13 = arith.maximumf %11, %12 : vector<1x4x1xf32>
    %cst_6 = arith.constant 9.99999974E-6 : f32
    %14 = vector.broadcast %cst_6 : f32 to vector<1x4x1xf32>
    %15 = arith.addf %13, %14 : vector<1x4x1xf32>
    %16 = math.rsqrt %15 : vector<1x4x1xf32>
    %cst_7 = arith.constant dense<0.000000e+00> : vector<1x1xf32>
    %17 = vector.multi_reduction <add>, %7, %cst_7 [1] : vector<1x4x1xf32> to vector<1x1xf32>
    %18 = vector.shape_cast %17 : vector<1x1xf32> to vector<1x1x1xf32>
    %cst_8 = arith.constant 4.000000e+00 : f32
    %19 = vector.broadcast %cst_8 : f32 to vector<1x1x1xf32>
    %20 = arith.divf %18, %19 : vector<1x1x1xf32>
    %21 = vector.broadcast %20 : vector<1x1x1xf32> to vector<1x4x1xf32>
    %22 = arith.subf %7, %21 : vector<1x4x1xf32>
    %23 = arith.mulf %22, %22 : vector<1x4x1xf32>
    %cst_9 = arith.constant dense<0.000000e+00> : vector<1x1xf32>
    %24 = vector.multi_reduction <add>, %23, %cst_9 [1] : vector<1x4x1xf32> to vector<1x1xf32>
    %25 = vector.shape_cast %24 : vector<1x1xf32> to vector<1x1x1xf32>
    %cst_10 = arith.constant 3.000000e+00 : f32
    %26 = vector.broadcast %cst_10 : f32 to vector<1x1x1xf32>
    %27 = arith.divf %25, %26 : vector<1x1x1xf32>
    %28 = vector.broadcast %20 : vector<1x1x1xf32> to vector<1x4x1xf32>
    %29 = arith.subf %7, %28 : vector<1x4x1xf32>
    %cst_11 = arith.constant 9.99999974E-6 : f32
    %30 = vector.broadcast %cst_11 : f32 to vector<1x1x1xf32>
    %31 = arith.addf %27, %30 : vector<1x1x1xf32>
    %32 = math.rsqrt %31 : vector<1x1x1xf32>
    %33 = vector.broadcast %32 : vector<1x1x1xf32> to vector<1x4x1xf32>
    %34 = arith.mulf %29, %33 : vector<1x4x1xf32>
    %c0_12 = arith.constant 0 : index
    %c0_13 = arith.constant 0 : index
    %c0_14 = arith.constant 0 : index
    %35 = vector.load %arg2[%c0_12, %c0_13, %c0_14] : memref<1x4x3xf32, #tpu.memory_space<vmem>>, vector<1x4x3xf32>
    %36 = vector.extract_strided_slice %35 {offsets = [0, 0, 0], sizes = [1, 4, 1], strides = [1, 1, 1]} : vector<1x4x3xf32> to vector<1x4x1xf32>
    %37 = vector.extract_strided_slice %35 {offsets = [0, 0, 1], sizes = [1, 4, 1], strides = [1, 1, 1]} : vector<1x4x3xf32> to vector<1x4x1xf32>
    %38 = vector.extract_strided_slice %35 {offsets = [0, 0, 2], sizes = [1, 4, 1], strides = [1, 1, 1]} : vector<1x4x3xf32> to vector<1x4x1xf32>
    %39 = arith.mulf %36, %16 : vector<1x4x1xf32>
    %40 = arith.mulf %37, %34 : vector<1x4x1xf32>
    %41 = arith.addf %40, %38 : vector<1x4x1xf32>
    %42 = arith.mulf %39, %7 : vector<1x4x1xf32>
    %43 = arith.subf %41, %42 : vector<1x4x1xf32>
    %44 = vector.broadcast %39 : vector<1x4x1xf32> to vector<1x4x256xf32>
    %45 = arith.mulf %0, %44 : vector<1x4x256xf32>
    %46 = vector.broadcast %43 : vector<1x4x1xf32> to vector<1x4x256xf32>
    %47 = arith.addf %45, %46 : vector<1x4x256xf32>
    %c0_15 = arith.constant 0 : index
    %c0_16 = arith.constant 0 : index
    %c0_17 = arith.constant 0 : index
    %48 = vector.load %arg3[%c0_15, %c0_16, %c0_17] : memref<1x4x256xf32, #tpu.memory_space<vmem>>, vector<1x4x256xf32>
    tpu.vector_store %arg3[%c0_15, %c0_16, %c0_17], %47 {strides = array<i32>} : memref<1x4x256xf32, #tpu.memory_space<vmem>>, vector<1x4x256xf32>,
    return
  }
  func.func @transform_0(%arg0: i32) -> (i32, i32, i32) {
    %c0_i32 = arith.constant 0 : i32
    %c0_i32_0 = arith.constant 0 : i32
    %c0_i32_1 = arith.constant 0 : i32
    return %arg0, %c0_i32, %c0_i32_0 : i32, i32, i32
  }
  func.func @transform_1(%arg0: i32) -> (i32, i32, i32) {
    %c0_i32 = arith.constant 0 : i32
    %c0_i32_0 = arith.constant 0 : i32
    %c0_i32_1 = arith.constant 0 : i32
    return %arg0, %c0_i32, %c0_i32_0 : i32, i32, i32
  }
  func.func @transform_2(%arg0: i32) -> (i32, i32, i32) {
    %c0_i32 = arith.constant 0 : i32
    %c0_i32_0 = arith.constant 0 : i32
    %c0_i32_1 = arith.constant 0 : i32
    return %arg0, %c0_i32, %c0_i32_0 : i32, i32, i32
  }
}

</mosaic_0001>

<bundles_post_ra>
// kernel: tpu_custom_call.1
= control target key start
LH: loop header
LB: loop body
LE: loop exit
PB: predicated region body
PF: predicated region fallthrough
CT: control target
= control target key end

     0   :  { %7 = vsyncpa [#allocation3], 0  ;;  %s744_s0 = inlined_call_operand.hbm [shape: f32[2,4,256], index: 0, kind: input, shape index: {}]   ;;  %s745_s1 = inlined_call_operand.vmem [shape: f32[2,4,3], index: 1, kind: input, shape index: {}]   ;;  %s746_s2 = inlined_call_operand.hbm [shape: f32[2,4,256], index: 2, kind: output, shape index: {}]  }
   0x1   :  { %9 = vsyncpa [#allocation3 + $0x1], 0 }
   0x2   :  { %10 = vsyncpa [#allocation4], 0 }
   0x3   :  { %12 = vsyncpa [#allocation4 + $0x1], 0  ;;  %s560_s9 = smov 0   ;;  %s562_s10 = smov 0  }
   0x4   :  { %s564_s11 = smov 0   ;;  %s566_s12 = smov 0  }
   0x5 LB: > { %s581_s13 = sadd.s32 4294967295, %s536_s12   ;;  %s364_s14 = sadd.s32 4294967294, %s536_s12   ;;  %s536_s12 = sphi %s566_s12, %s761_s12   ;;  %s532_s11 = sphi %s564_s11, %s760_s11   ;;  %s528_s10 = sphi %s562_s10, %s759_s10   ;;  %s524_s9 = sphi %s560_s9, %s758_s9  }
   0x6   : > { %s585_s15 = sadd.s32 1, %s536_s12   ;;  %s25_s16 = sadd.s32 1, %s532_s11 }
   0x7   : > { %s22_s17 = ssub.s32 %s536_s12, %s585_s15  ;;  %p32_p0 = scmp.ne.s32.totalorder %s532_s11, %s528_s10 }
   0x8   : > { %p23_p1 = scmp.eq.s32.totalorder %s22_s17, 0  ;;  %p33_p2 = scmp.eq.s32.totalorder %s536_s12, 0 }
   0x9   : > { %p38_p3 = scmp.ne.s32.totalorder %s528_s10, %s524_s9  ;;  %p39_p4 = scmp.eq.s32.totalorder %s581_s13, 0 }
   0xa   : > { %s597_s18 = scalar_select %p23_p1, %s532_s11, %s25_s16  }
   0xb   : > { %p599_p5 = por %p33_p2, %p32_p0  ;;  %p603_p6 = por %p39_p4, %p38_p3 }
   0xc   : > { %p88_p7 = scmp.eq.s32.totalorder %s581_s13, 1  ;;  %p94_p8 = scmp.eq.s32.totalorder %s364_s14, 1 }
   0xd   : > { %p393_p10 = scmp.lt.s32.totalorder %s536_s12, 2  ;;  %s114_s23 = sand.u32 1, %s532_s11  }
   0xe   : > { %p610_p11 = por %p88_p7, %p32_p0  ;;  %p614_p12 = por %p94_p8, %p38_p3 }
   0xf   : > { %s379_s24 = sshll.u32 %s536_s12, 7  ;;  %s367_s25 = sshll.u32 %s114_s23, 3 }
  0x10   : > { %s750_s21 = scalar_select %p610_p11, 1, 0 }
  0x11   : > { %s751_s22 = scalar_select %p614_p12, 1, 0 }
  0x12   : > { %s623_s28 = scalar_lea.hbm %s744_s0, %s379_s24  ;;  %s118_s29 = scalar_lea.vmem [#allocation2], %s367_s25 }
  0x13   : > { %s126_s30 = sshll.u32 %s118_s29, 4  ;;  %p627_p13 = pnand %p393_p10, %p599_p5  ;;  %s631_s30 = int_to_ptr.vmem [resolvable:$true] %s126_s30 }
  0x14   : > { %s115_s4 = scalar_lea.sflag [#allocation3], %s114_s23  ;;  %s440_s5 = scalar_lea.hbm %s623_s28, 128 }
  0x15   : > { %p441_p2 = scmp.ne.s32.totalorder %s623_s28, %s440_s5  ;;  %p442_p3 = pneg %p627_p13 }
  0x16   : > { %s445_s8 = scalar_lea.hbm %s744_s0, 256  ;;  %p446_p5 = scmp.lt.u32.totalorder %s623_s28, %s744_s0 }
  0x17   : > { %p443_p4 = pnand %p442_p3, %p441_p2  ;;  %p447_p8 = scmp.lt.u32.totalorder %s445_s8, %s440_s5 }
  0x18   : > { %p449_p9 = scmp.lt.u32.totalorder %s440_s5, %s623_s28 }
  0x19   : > { %p444_p7 = pneg %p443_p4  ;;  %p448_p10 = por %p447_p8, %p446_p5 }
  0x1b   : > { %p450_p0 = por %p449_p9, %p448_p10 }
  0x1d   : > { %p451_p1 = pnand %p450_p0, %p444_p7 }
  0x1f   : > { %454 = shalt.err (!%p451_p1)
}
  0x20   : > { %s455_s17 = scalar_lea.vmem %s631_s30, 128  ;;  %s538_s19 = smov [#allocation2]  }
  0x21   : > { %p456_p2 = scmp.ne.s32.totalorder %s631_s30, %s455_s17  ;;  %s460_s23 = sshll.u32 %s538_s19, 4  ;;  %s461_s23 = int_to_ptr.vmem [resolvable:$false] %s460_s23 }
  0x22   : > { %s462_s24 = scalar_lea.vmem %s461_s23, 256  ;;  %p463_p11 = scmp.lt.s32.totalorder %s631_s30, %s461_s23 }
  0x23   : > { %p458_p4 = pnand %p456_p2, %p442_p3  ;;  %p464_p5 = scmp.lt.s32.totalorder %s462_s24, %s455_s17 }
  0x25   : > { %p459_p12 = pneg %p458_p4  ;;  %p465_p8 = por %p464_p5, %p463_p11 }
  0x27   : > { %p466_p9 = pnand %p465_p8, %p459_p12 }
  0x29   : > { %469 = shalt.err (!%p466_p9)
}
  0x2a   : > { %388 = dma.hbm_to_vmem [thread:$0]  (!%p627_p13), %s623_s28, 128, %s631_s30, %s115_s4  }
  0x2b   : > { %p753_p0 = scmp.lt.s32.totalorder %s536_s12, 3  ;;  %p754_p1 = scmp.ge.s32.totalorder %s536_s12, 1 }
  0x2d   : > { %p139_p3 = pnand %p754_p1, %p753_p0 }
  0x2e   : > { %s665_s25 = sand.u32 (!%p139_p3), 1, %s528_s10  }
  0x2f   : > { %142 = sbr.rel (%p139_p3) target bundleno = 493 (0x1ed), region = 28  ;;  %s371_s26 = sshll.u32 (!%p139_p3), %s665_s25, 3 }
  0x30   : > { %s145_s27 = scalar_lea.sflag (!%p139_p3), [#allocation3], %s665_s25  ;;  %s148_s29 = scalar_lea.vmem (!%p139_p3), [#allocation2], %s371_s26 }
  0x36   : > { %515 = dma.done.wait (%p603_p6), %s145_s27, 128  }
  0x37   : > { %517 = vsyncadd (%p603_p6), %s145_s27, 4294967168  ;;  %p173_p11 = scmp.lt.s32.totalorder %s581_s13, 1  ;;  %vm181_vm0 = vcmask 1043456   ;;  %v680_v0 = vld [vmem:[%s148_s29] sm:$0xff]  ;;  %s539_s20 = smov 127   ;;  %v540_v11 = vmov 0   ;;  %v247_v52 = vlaneseq }
  0x38   : > { %v179_v2 = vcombine.high %v680_v0, %v680_v0  ;;  %v182_v3 = vsel %vm181_vm0, %v680_v0, 0.0  ;;  %v187_v4 = vmul.f32 %v680_v0, %v680_v0  ;;  %432 = vset.pattern.permute.xlu0 %v540_v11  ;;  %v541_v20 = vmov 1   ;;  %s542_s6 = smov 1   ;;  %s380_s7 = sshll.u32 %s581_s13, 7 }
  0x39   : > { %s174_s28 = scalar_select %p173_p11, %s581_s13, 1  ;;  %433 = vset.pattern.permute.xlu1 %v541_v20  ;;  %v543_v50 = vmov 839922192   ;;  %v248_v54 = vshrl.u32 %v247_v52, 7 }
  0x3a   : > { %v183_v5 = vsel %vm181_vm0, %v179_v2, 0.0  ;;  %v189_v6 = vcombine.high %v187_v4, %v187_v4  ;;  %v191_v7 = vsel %vm181_vm0, %v187_v4, 0.0  ;;  %v245_v51 = vunpack.c.l.s4 %v543_v50  ;;  %s172_s8 = scalar_lea.vmem [#allocation5], %s371_s26  ;;  %s700_s19 = scalar_lea.hbm %s746_s2, %s380_s7 }
  0x3b   : > { %s373_s30 = sshll.u32 %s174_s28, 2  ;;  %v184_v8 = vadd.f32 %v183_v5, %v182_v3  ;;  %s282_s14 = sshll.u32 %s172_s8, 4  ;;  %s702_s14 = int_to_ptr.vmem [resolvable:$true] %s282_s14 }
  0x3c   : > { %s176_s5 = scalar_lea.vmem %s745_s1, %s373_s30  ;;  %v192_v9 = vsel %vm181_vm0, %v189_v6, 0.0  ;;  %v246_v53 = vunpack.c.0.s8 %v245_v51  ;;  %s268_s23 = scalar_lea.sflag [#allocation4], %s665_s25 }
  0x3d   : > { %v226_v1 = vld [vmem:[%s176_s5] sm:$0xf]  ;;  %185 = vadd.xlane.f32.xlu0 %v184_v8  ;;  %v193_v10 = vadd.f32 %v192_v9, %v191_v7  ;;  %s470_s13 = scalar_lea.vmem %s702_s14, 128  ;;  %p755_p12 = scmp.ne.s32.totalorder %s750_s21, 0 }
  0x3e   : > { %230 = vrot.lane.b32.xlu1 %v226_v1, %s539_s20  ;;  %v249_v55 = vsub.s32 %v246_v53, %v248_v54  ;;  %p471_p6 = scmp.ne.s32.totalorder %s702_s14, %s470_s13  ;;  %s544_s24 = smov [#allocation5]  }
  0x3f   : > { %s474_s26 = sshll.u32 %s544_s24, 4  ;;  %s475_s26 = int_to_ptr.vmem [resolvable:$false] %s474_s26 }
  0x40   : > { %p472_p13 = pnand %p471_p6, %p755_p12  ;;  %s476_s27 = scalar_lea.vmem %s475_s26, 256 }
  0x41   : > { %194 = vadd.xlane.f32.xlu0 %v193_v10  ;;  %p477_p10 = scmp.lt.s32.totalorder %s702_s14, %s475_s26  ;;  %p478_p2 = scmp.lt.s32.totalorder %s476_s27, %s470_s13 }
  0x42   : > { %p473_p7 = pneg %p472_p13 }
  0x43   : > { %p479_p4 = por %p478_p2, %p477_p10 }
  0x45   : > { %p480_p5 = pnand %p479_p4, %p473_p7 }
  0xb0   : > { %v231_v46 = vpop.permute.xlu1 %230 }
  0xca   : > { %v186_v12 = vpop.xlane.xlu0 %185 }
  0xcb   : > { %v196_v13 = vmul.f32 0.00390625, %v186_v12 }
  0xcd   : > { %v198_v15 = vmul.f32 %v196_v13, %v196_v13  ;;  %v203_v24 = vsel %vm181_vm0, %v196_v13, 0.0 }
  0xce   : > { %v195_v14 = vpop.xlane.xlu0 %194  ;;  %v204_v25 = vrot.slane %v203_v24, 4 }
  0xcf   : > { %v197_v16 = vmul.f32 0.00390625, %v195_v14 }
  0xd0   : > { %v205_v26 = vadd.f32 %v204_v25, %v203_v24 }
  0xd1   : > { %v199_v17 = vsub.f32 %v197_v16, %v198_v15 }
  0xd2   : > { %v206_v27 = vrot.slane %v205_v26, 2 }
  0xd3   : > { %v200_v18 = vmax.f32 %v199_v17, 0.0 }
  0xd4   : > { %v207_v28 = vadd.f32 %v206_v27, %v205_v26 }
  0xd5   : > { %v201_v19 = vadd.f32 1e-05, %v200_v18 }
  0xd6   : > { %v208_v29 = vrot.slane %v207_v28, 1 }
  0xd7   : > { %436 = vrsqrt.f32 %v201_v19 }
  0xd8   : > { %v209_v30 = vadd.f32 %v208_v29, %v207_v28 }
  0xda   : > { %v211_v31 = vmul.f32 0.25, %v209_v30 }
  0xdc   : > { %v212_v32 = vsub.f32 %v196_v13, %v211_v31 }
  0xde   : > { %v213_v33 = vmul.f32 %v212_v32, %v212_v32 }
  0xe0   : > { %v214_v34 = vsel %vm181_vm0, %v213_v33, 0.0 }
  0xe1   : > { %v437_v21 = vpop.eup %436  ;;  %v215_v35 = vrot.slane %v214_v34, 4 }
  0xe2   : > { %v227_v22 = vmul.f32 %v437_v21, %v226_v1 }
  0xe3   : > { %v216_v36 = vadd.f32 %v215_v35, %v214_v34 }
  0xe4   : > { %242 = vperm.xlu0 %432, %v227_v22   ;;  %v234_v23 = vmul.f32 %v227_v22, %v196_v13 }
  0xe5   : > { %v217_v37 = vrot.slane %v216_v36, 2 }
  0xe6   : > { %236 = vrot.lane.b32.xlu1 %v234_v23, %s542_s6 }
  0xe7   : > { %v218_v38 = vadd.f32 %v217_v37, %v216_v36 }
  0xe8   : > { %434 = vset.pattern.permute.xlu0 %v541_v20 }
  0xe9   : > { %v219_v39 = vrot.slane %v218_v38, 1 }
  0xeb   : > { %v220_v40 = vadd.f32 %v219_v39, %v218_v38 }
  0xed   : > { %v222_v41 = vmul.f32 0.33333334, %v220_v40 }
  0xef   : > { %v223_v42 = vadd.f32 1e-05, %v222_v41 }
  0xf1   : > { %438 = vrsqrt.f32 %v223_v42 }
  0xfb   : > { %v439_v43 = vpop.eup %438 }
  0xfc   : > { %v225_v44 = vmul.f32 %v439_v43, %v212_v32 }
  0xfe   : > { %v228_v45 = vmul.f32 %v226_v1, %v225_v44 }
 0x100   : > { %v233_v47 = vadd.f32 %v231_v46, %v228_v45 }
 0x158   : > { %v237_v48 = vpop.permute.xlu1 %236 }
 0x159   : > { %v239_v49 = vsub.f32 %v233_v47, %v237_v48 }
 0x15b   : > { %255 = vperm.xlu1 %433, %v239_v49  }
 0x163   : > { %v243_v56 = vpop.permute.xlu0 %242 }
 0x164   : > { %v250_v57 = vrot.slane %v243_v56, %v249_v55 }
 0x166   : > { %v252_v59 = vmul.f32 %v250_v57, %v680_v0 }
 0x1da   : > { %v256_v58 = vpop.permute.xlu1 %255 }
 0x1db   : > { %v263_v60 = vrot.slane %v256_v58, %v249_v55 }
 0x1dd   : > { %v265_v61 = vadd.f32 %v263_v60, %v252_v59 }
 0x1df   : > { %266 = vst [vmem:[%s172_s8] sm:$0xff] %v265_v61 }
 0x1e0   : > { %483 = shalt.err (!%p480_p5)
}
 0x1e1   : > { %s484_s25 = scalar_lea.hbm %s700_s19, 128  ;;  %s488_s30 = scalar_lea.hbm %s746_s2, 256 }
 0x1e2   : > { %p485_p8 = scmp.ne.s32.totalorder %s700_s19, %s484_s25  ;;  %p489_p1 = scmp.lt.u32.totalorder %s700_s19, %s746_s2 }
 0x1e3   : > { %p490_p3 = scmp.lt.u32.totalorder %s488_s30, %s484_s25  ;;  %p492_p6 = scmp.lt.u32.totalorder %s484_s25, %s700_s19 }
 0x1e4   : > { %p486_p9 = pnand %p485_p8, %p755_p12 }
 0x1e5   : > { %p491_p11 = por %p490_p3, %p489_p1 }
 0x1e6   : > { %p487_p0 = pneg %p486_p9 }
 0x1e7   : > { %p493_p13 = por %p492_p6, %p491_p11 }
 0x1e9   : > { %p494_p7 = pnand %p493_p13, %p487_p0 }
 0x1eb   : > { %497 = shalt.err (!%p494_p7)
}
 0x1ec   : > { %383 = dma.vmem_to_hbm [thread:$0]  (%p755_p12), %s702_s14, 128, %s700_s19, %s268_s23  }
 0x1ed PF: > { %s294_s5 = sand.u32 1, %s524_s9   ;;  %p756_p10 = scmp.ne.s32.totalorder %s751_s22, 0 }
 0x1ee   : > { %p757_p2 = scmp.ge.s32.totalorder %s536_s12, 2  ;;  %s295_s20 = scalar_lea.sflag [#allocation4], %s294_s5 }
 0x1f0   : > { %p390_p4 = pnand %p757_p2, %p756_p10 }
 0x1f2   : > { %519 = dma.done.wait (!%p390_p4), %s295_s20, 128  }
 0x1f3   : > { %521 = vsyncadd (!%p390_p4), %s295_s20, 4294967168  ;;  %p15_p5 = scmp.ge.s32.totalorder %s585_s15, 4   ;;  %s758_s9 = smov %s528_s10 }
 0x1f4   : > { %s759_s10 = smov %s532_s11  ;;  %s760_s11 = smov %s597_s18 }
 0x1f5   : > { %s761_s12 = smov %s585_s15  ;;  %17 = sbr.rel (!%p15_p5) target bundleno = 5 (0x5), region = 76 }
 0x1fc   :  { %300 = vsyncpa [#allocation3], 1 }
 0x1fd   :  { %302 = vsyncpa [#allocation3 + $0x1], 1 }
 0x1fe   :  { %303 = vsyncpa [#allocation4], 1 }
 0x1ff   :  { %305 = vsyncpa [#allocation4 + $0x1], 1 }

</bundles_post_ra>
